<compile_context>
chip_gen: v6e
topology: v6e:2x2x1
jax: 0.10.0
libtpu: 0.0.40
codegen_flags: <defaults>
</compile_context>

<pallas_src>
import functools

import jax
import jax.numpy as jnp
from jax.experimental import pallas as pl
from jax.experimental.pallas import tpu as pltpu


def _round_up(n: int, m: int) -> int:
    return ((n + m - 1) // m) * m


def _cdiv(a: int, b: int) -> int:
    return (a + b - 1) // b


def _vmem_budget_bytes() -> int:
    """Per-kernel VMEM budget with headroom for Mosaic-internal scratch."""
    cap = 64 * 1024 * 1024          # conservative fallback (v7x per-TC VMEM)
    try:
        info = pltpu.get_tpu_info()
        cap = int(getattr(info, "vmem_capacity_bytes", cap))
    except Exception:
        pass
    return (cap * 3) // 4           # ~96 MiB on 128 MiB chips, ~48 MiB on v7x


def _tensorcores_per_chip() -> int:
    try:
        info = pltpu.get_tpu_info()
        for attr in ("num_cores", "num_tensorcores", "tensorcores_per_chip",
                     "core_count"):
            v = getattr(info, attr, None)
            if isinstance(v, int) and v > 0:
                return v
    except Exception:
        pass
    return 1


def _choose_tiles(B, T, Dp, Hp, Op, x_isize, w_isize, xp_isize, budget,
                  n_cores, max_time_chunk):
    """Pick (TB, Bp, Tc, n_chunks) so the kernel fits the VMEM budget."""
    Bp = _round_up(B, 8)
    TB = min(Bp, 128)
    # v7x: with 2 TensorCores, make sure the "parallel" batch axis has >=2 tiles.
    if n_cores >= 2 and Bp // TB <= 1 and Bp >= 16:
        TB = _round_up(_cdiv(Bp, 2), 8)
    Bp = _round_up(Bp, TB)

    tc_cap_max = T if max_time_chunk is None else max(1, min(T, max_time_chunk))

    def vmem_need(tc, tb):
        x_buf = 2 * tc * tb * Dp * x_isize          # double-buffered x chunk
        xproj = tc * tb * Hp * xp_isize             # staging scratch
        xtemp = tc * tb * Hp * 4                    # possible unfused f32 temp
        h_buf = tb * Hp * 4                         # persistent hidden state
        wts = 2 * (Dp * Hp + Hp * Hp + Hp * Op) * w_isize
        bias = 2 * (Hp + Op) * 4
        outb = 2 * tb * Op * 4
        return x_buf + xproj + xtemp + h_buf + wts + bias + outb

    while True:
        for cap in (64, 32, 16, 8, 4, 2, 1):
            cap = min(cap, tc_cap_max)
            n_chunks = _cdiv(T, cap)
            Tc = _cdiv(T, n_chunks)                 # minimizes trailing time pad
            if vmem_need(Tc, TB) <= budget:
                return TB, Bp, Tc, n_chunks
        if TB > 8:
            TB = max(8, _round_up(TB // 2, 8))
            Bp = _round_up(_round_up(B, 8), TB)
        else:
            return TB, Bp, 1, T                     # best effort


def rnn_fc_kernel(x_ref, wih_ref, whh_ref, b_ref, wfc_ref, bfc_ref, out_ref,
                  xproj_ref, h_ref, *, t_total, ragged, split_chains, unroll):
    """One (batch tile, time chunk) grid step of the RNN + FC forward.

    x_ref:     (Tc, TB, Dp)  input chunk, time-major        (f32 / bf16)
    wih_ref:   (Dp, Hp)      W_ih^T, zero-padded            (f32 / bf16)
    whh_ref:   (Hp, Hp)      W_hh^T, zero-padded            (f32 / bf16)
    b_ref:     (1, Hp)       b_ih + b_hh, zero-padded       (f32)
    wfc_ref:   (Hp, Op)      W_fc^T, zero-padded            (f32 / bf16)
    bfc_ref:   (1, Op)       b_fc, zero-padded              (f32)
    out_ref:   (TB, Op)      output tile                    (f32)
    xproj_ref: (Tc, TB, Hp)  VMEM staging scratch           (f32 / bf16)
    h_ref:     (TB, Hp)      persistent hidden state        (f32)
    """
    Tc, TB, Dp = x_ref.shape
    Hp = whh_ref.shape[1]
    t_idx = pl.program_id(1)

    # Reset the persistent hidden-state carry at the start of each batch tile.
    @pl.when(t_idx == 0)
    def _():
        h_ref[...] = jnp.zeros_like(h_ref)

    # --- (1) Time-parallel input projection for this chunk: ONE big MXU matmul
    #     over all Tc*TB rows, bias folded in once.  (h_{-1}==0 makes step 0's
    #     h@W_hh a no-op, so no special-casing is needed.)
    x2d = x_ref[...].reshape(Tc * TB, Dp)
    xproj = (jnp.dot(x2d, wih_ref[...], preferred_element_type=jnp.float32)
             + b_ref[...])
    xproj_ref[...] = xproj.reshape(Tc, TB, Hp).astype(xproj_ref.dtype)

    whh = whh_ref[...]
    base_t = t_idx * Tc

    def guard(t, new, old):
        # Keep the previous hidden state for end-padded time steps (only emitted
        # when padding exists).
        if not ragged:
            return new
        return jnp.where(base_t + t < t_total, new, old)

    # --- (2) Serial recurrence over this chunk: only h @ W_hh sits on the
    #     latency chain; f32 carry, f32 accumulation, bounded unroll.
    # TODO(synk): hold W_hh in the MXU weight staging across the recurrence via
    # pltpu.matmul_push_rhs / matmul_acc_lhs / matmul_pop once verified per chip.
    if split_chains:
        half = TB // 2

        def step(t, carry):
            ha, hb = carry
            # Two independent batch sub-chains: chain b's MXU matmul overlaps
            # chain a's EUP tanh on the serial critical path.
            hha = jnp.dot(ha.astype(whh.dtype), whh,
                          preferred_element_type=jnp.float32)
            hhb = jnp.dot(hb.astype(whh.dtype), whh,
                          preferred_element_type=jnp.float32)
            xp = xproj_ref[t].astype(jnp.float32)
            na = jnp.tanh(xp[:half] + hha)
            nb = jnp.tanh(xp[half:] + hhb)
            return (guard(t, na, ha), guard(t, nb, hb))

        ha, hb = jax.lax.fori_loop(
            0, Tc, step, (h_ref[:half, :], h_ref[half:, :]), unroll=unroll)
        h_ref[:half, :] = ha
        h_ref[half:, :] = hb
    else:
        def step(t, h):
            hh = jnp.dot(h.astype(whh.dtype), whh,
                         preferred_element_type=jnp.float32)
            hn = jnp.tanh(xproj_ref[t].astype(jnp.float32) + hh)
            return guard(t, hn, h)

        h_ref[...] = jax.lax.fori_loop(0, Tc, step, h_ref[...], unroll=unroll)

    # --- (3) Final Linear on the last hidden state (lane-dense store), once per
    #     batch tile.
    @pl.when(t_idx == pl.num_programs(1) - 1)
    def _():
        out_ref[...] = (
            jnp.dot(h_ref[...].astype(wfc_ref.dtype), wfc_ref[...],
                    preferred_element_type=jnp.float32) + bfc_ref[...])


@functools.partial(jax.jit, static_argnames=("use_bf16_matmul",
                                              "max_time_chunk"))
def rnn_model_forward(x, w_ih, w_hh, b_ih, b_hh, w_fc, b_fc, *,
                      use_bf16_matmul=True, max_time_chunk=None):
    """RNNModel.forward: x (B, T, D) -> (B, output_size).

    w_ih: (H, D), w_hh: (H, H), b_ih/b_hh: (H,)   -- nn.RNN weights
    w_fc: (O, H), b_fc: (O,)                      -- nn.Linear weights
    bf16 MXU inputs by default (f32 accumulation); pass
    use_bf16_matmul=False for a bit-tight f32 path.
    """
    B, T, D = x.shape
    H = w_hh.shape[0]
    O = w_fc.shape[0]

    # Lane/sublane-aligned padded sizes.
    Dp = _round_up(D, 128)
    Hp = _round_up(H, 128)
    Op = _round_up(O, 128)

    cdt = jnp.bfloat16 if use_bf16_matmul else jnp.float32
    xp_dtype = jnp.bfloat16 if use_bf16_matmul else jnp.float32
    x_isize = 2 if use_bf16_matmul else 4
    w_isize = x_isize
    xp_isize = 2 if use_bf16_matmul else 4

    budget = _vmem_budget_bytes()
    n_cores = _tensorcores_per_chip()
    TB, Bp, Tc, n_chunks = _choose_tiles(
        B, T, Dp, Hp, Op, x_isize, w_isize, xp_isize, budget, n_cores,
        max_time_chunk)
    Tp = Tc * n_chunks
    ragged = Tp != T
    split_chains = (TB >= 16) and (TB % 16 == 0)
    unroll = max(1, min(8, Tc))

    # Time-major, zero-padded input: (Tp, Bp, Dp).
    x_tm = jnp.transpose(jnp.asarray(x, jnp.float32), (1, 0, 2))
    x_tm = jnp.pad(x_tm, ((0, Tp - T), (0, Bp - B), (0, Dp - D))).astype(cdt)

    # PyTorch stores weights as (out, in); transpose to (in, out), zero-pad.
    wih_t = jnp.pad(jnp.asarray(w_ih, jnp.float32).T,
                    ((0, Dp - D), (0, Hp - H))).astype(cdt)       # (Dp, Hp)
    whh_t = jnp.pad(jnp.asarray(w_hh, jnp.float32).T,
                    ((0, Hp - H), (0, Hp - H))).astype(cdt)       # (Hp, Hp)
    wfc_t = jnp.pad(jnp.asarray(w_fc, jnp.float32).T,
                    ((0, Hp - H), (0, Op - O))).astype(cdt)       # (Hp, Op)
    b_sum = jnp.pad(jnp.asarray(b_ih + b_hh, jnp.float32),
                    (0, Hp - H))[None, :]                         # (1, Hp) f32
    bfc_p = jnp.pad(jnp.asarray(b_fc, jnp.float32),
                    (0, Op - O))[None, :]                         # (1, Op) f32

    cost = pl.CostEstimate(
        flops=2 * T * B * (D * H + H * H) + 2 * B * H * O,
        transcendentals=T * B * H,
        bytes_accessed=(Tp * Bp * Dp * x_isize
                        + (Dp * Hp + Hp * Hp + Hp * Op) * w_isize
                        + (Hp + Op) * 4 + Bp * Op * 4),
    )

    kernel = functools.partial(rnn_fc_kernel, t_total=T, ragged=ragged,
                               split_chains=split_chains, unroll=unroll)

    grid = (Bp // TB, n_chunks)
    out_padded = pl.pallas_call(
        kernel,
        out_shape=jax.ShapeDtypeStruct((Bp, Op), jnp.float32),
        grid_spec=pltpu.PrefetchScalarGridSpec(
            num_scalar_prefetch=0,
            grid=grid,
            in_specs=[
                pl.BlockSpec((Tc, TB, Dp), lambda i, t: (t, i, 0)),  # x chunk
                pl.BlockSpec((Dp, Hp), lambda i, t: (0, 0)),   # W_ih^T (resident)
                pl.BlockSpec((Hp, Hp), lambda i, t: (0, 0)),   # W_hh^T (resident)
                pl.BlockSpec((1, Hp), lambda i, t: (0, 0)),    # b_ih + b_hh
                pl.BlockSpec((Hp, Op), lambda i, t: (0, 0)),   # W_fc^T (resident)
                pl.BlockSpec((1, Op), lambda i, t: (0, 0)),    # b_fc
            ],
            out_specs=pl.BlockSpec((TB, Op), lambda i, t: (i, 0)),
            scratch_shapes=[
                pltpu.VMEM((Tc, TB, Hp), xp_dtype),   # xproj staging
                pltpu.VMEM((TB, Hp), jnp.float32),    # persistent hidden state
            ],
        ),
        compiler_params=pltpu.CompilerParams(
            dimension_semantics=("parallel", "arbitrary"),
            vmem_limit_bytes=budget,
        ),
        cost_estimate=cost,
    )(x_tm, wih_t, whh_t, b_sum, wfc_t, bfc_p)

    return out_padded[:B, :O]


def _reference_forward(x, w_ih, w_hh, b_ih, b_hh, w_fc, b_fc):
    """Pure-JAX reference matching PyTorch nn.RNN + nn.Linear semantics."""
    B, T, D = x.shape
    H = w_hh.shape[0]
    h = jnp.zeros((B, H), jnp.float32)
    for t in range(T):
        h = jnp.tanh(x[:, t, :] @ w_ih.T + b_ih + h @ w_hh.T + b_hh)
    return h @ w_fc.T + b_fc


def _make_params(key, input_size, hidden_size, output_size):
    ks = jax.random.split(key, 7)
    k_rnn = 1.0 / jnp.sqrt(hidden_size)
    w_ih = jax.random.uniform(ks[0], (hidden_size, input_size), jnp.float32,
                              -k_rnn, k_rnn)
    w_hh = jax.random.uniform(ks[1], (hidden_size, hidden_size), jnp.float32,
                              -k_rnn, k_rnn)
    b_ih = jax.random.uniform(ks[2], (hidden_size,), jnp.float32, -k_rnn, k_rnn)
    b_hh = jax.random.uniform(ks[3], (hidden_size,), jnp.float32, -k_rnn, k_rnn)
    w_fc = jax.random.uniform(ks[4], (output_size, hidden_size), jnp.float32,
                              -k_rnn, k_rnn)
    b_fc = jax.random.uniform(ks[5], (output_size,), jnp.float32, -k_rnn, k_rnn)
    return w_ih, w_hh, b_ih, b_hh, w_fc, b_fc, ks[6]


if __name__ == "__main__":
    key = jax.random.PRNGKey(0)

    # --- Test 1: spec-sized shapes (batch=2, seq=8, input=16, hidden=32, out=8)
    B, T, input_size, hidden_size, output_size = 2, 8, 16, 32, 8
    w_ih, w_hh, b_ih, b_hh, w_fc, b_fc, kx = _make_params(
        key, input_size, hidden_size, output_size)
    x = jax.random.normal(kx, (B, T, input_size), jnp.float32)
    ref = _reference_forward(x, w_ih, w_hh, b_ih, b_hh, w_fc, b_fc)

    # Default path: bf16 MXU inputs, f32 accumulation.
    out_bf16 = jax.block_until_ready(
        rnn_model_forward(x, w_ih, w_hh, b_ih, b_hh, w_fc, b_fc))
    assert out_bf16.shape == (B, output_size)
    assert jnp.allclose(out_bf16, ref, atol=5e-2, rtol=5e-2)

    # Bit-tight f32 path.
    out_f32 = jax.block_until_ready(
        rnn_model_forward(x, w_ih, w_hh, b_ih, b_hh, w_fc, b_fc,
                          use_bf16_matmul=False))
    assert out_f32.shape == (B, output_size)
    assert jnp.allclose(out_f32, ref, atol=1e-5, rtol=1e-5)

    # --- Test 2: exercise multi-chunk pipeline, ragged last chunk and the
    #     dual-chain recurrence (f32 path for a tight check).
    B2, T2 = 32, 20
    key2 = jax.random.PRNGKey(1)
    w_ih2, w_hh2, b_ih2, b_hh2, w_fc2, b_fc2, kx2 = _make_params(
        key2, input_size, hidden_size, output_size)
    x2 = jax.random.normal(kx2, (B2, T2, input_size), jnp.float32)
    ref2 = _reference_forward(x2, w_ih2, w_hh2, b_ih2, b_hh2, w_fc2, b_fc2)

    out2 = jax.block_until_ready(
        rnn_model_forward(x2, w_ih2, w_hh2, b_ih2, b_hh2, w_fc2, b_fc2,
                          use_bf16_matmul=False, max_time_chunk=8))
    assert out2.shape == (B2, output_size)
    assert jnp.allclose(out2, ref2, atol=1e-4, rtol=1e-4)

    print("KERNEL_OK")
</pallas_src>

<mosaic_0001>
module attributes {stable_mosaic.version = 11 : i64} {
  func.func @rnn_fc_kernel(%arg0: i32, %arg1: i32, %arg2: memref<8x8x128xbf16, #tpu.memory_space<vmem>>, %arg3: memref<128x128xbf16, #tpu.memory_space<vmem>>, %arg4: memref<128x128xbf16, #tpu.memory_space<vmem>>, %arg5: memref<1x128xf32, #tpu.memory_space<vmem>>, %arg6: memref<128x128xbf16, #tpu.memory_space<vmem>>, %arg7: memref<1x128xf32, #tpu.memory_space<vmem>>, %arg8: memref<8x128xf32, #tpu.memory_space<vmem>>, %arg9: memref<8x8x128xbf16, #tpu.memory_space<vmem>>, %arg10: memref<8x128xf32, #tpu.memory_space<vmem>>) attributes {dimension_semantics = [#tpu.dimension_semantics<parallel>, #tpu.dimension_semantics<arbitrary>], iteration_bounds = array<i64: 1, 1>, scalar_prefetch = 0 : i64, scratch_operands = 2 : i64, tpu.core_type = #tpu.core_type<tc>, window_params = [{transform_indices = @transform_0, window_bounds = array<i64: 8, 8, 128>}, {pipeline_mode = #tpu.pipeline_mode<synchronous>, transform_indices = @transform_1, window_bounds = array<i64: 128, 128>}, {pipeline_mode = #tpu.pipeline_mode<synchronous>, transform_indices = @transform_2, window_bounds = array<i64: 128, 128>}, {pipeline_mode = #tpu.pipeline_mode<synchronous>, transform_indices = @transform_3, window_bounds = array<i64: 1, 128>}, {pipeline_mode = #tpu.pipeline_mode<synchronous>, transform_indices = @transform_4, window_bounds = array<i64: 128, 128>}, {pipeline_mode = #tpu.pipeline_mode<synchronous>, transform_indices = @transform_5, window_bounds = array<i64: 1, 128>}, {transform_indices = @transform_6, window_bounds = array<i64: 8, 128>}]} {
    %c0_i32 = arith.constant 0 : i32
    %0 = arith.cmpi eq, %arg1, %c0_i32 : i32
    %1 = arith.extui %0 : i1 to i32
    %c0_i32_0 = arith.constant 0 : i32
    %2 = arith.cmpi ne, %1, %c0_i32_0 : i32
    scf.if %2 {
      %cst_43 = arith.constant 0.000000e+00 : f32
      %83 = vector.broadcast %cst_43 : f32 to vector<8x128xf32>
      %c0_44 = arith.constant 0 : index
      %c0_45 = arith.constant 0 : index
      %84 = vector.load %arg10[%c0_44, %c0_45] : memref<8x128xf32, #tpu.memory_space<vmem>>, vector<8x128xf32>
      tpu.vector_store %arg10[%c0_44, %c0_45], %83 {strides = array<i32>} : memref<8x128xf32, #tpu.memory_space<vmem>>, vector<8x128xf32>,
    } else {
    }
    %c0 = arith.constant 0 : index
    %c0_1 = arith.constant 0 : index
    %c0_2 = arith.constant 0 : index
    %3 = vector.load %arg2[%c0, %c0_1, %c0_2] : memref<8x8x128xbf16, #tpu.memory_space<vmem>>, vector<8x8x128xbf16>
    %4 = vector.shape_cast %3 : vector<8x8x128xbf16> to vector<64x128xbf16>
    %c0_3 = arith.constant 0 : index
    %c0_4 = arith.constant 0 : index
    %5 = vector.load %arg3[%c0_3, %c0_4] : memref<128x128xbf16, #tpu.memory_space<vmem>>, vector<128x128xbf16>
    %cst = arith.constant dense<0.000000e+00> : vector<64x128xf32>
    %6 = tpu.matmul %4, %5, %cst {dimension_numbers = #tpu.dot_dimension_numbers<[1], [0], [0], [1], [0, 0, 1, 1], [], []>} : vector<64x128xbf16>, vector<128x128xbf16>, vector<64x128xf32> -> vector<64x128xf32>
    %c0_5 = arith.constant 0 : index
    %c0_6 = arith.constant 0 : index
    %7 = vector.load %arg5[%c0_5, %c0_6] : memref<1x128xf32, #tpu.memory_space<vmem>>, vector<1x128xf32>
    %8 = vector.broadcast %7 : vector<1x128xf32> to vector<64x128xf32>
    %9 = arith.addf %6, %8 : vector<64x128xf32>
    %10 = vector.shape_cast %9 : vector<64x128xf32> to vector<8x8x128xf32>
    %11 = arith.truncf %10 : vector<8x8x128xf32> to vector<8x8x128xbf16>
    %c0_7 = arith.constant 0 : index
    %c0_8 = arith.constant 0 : index
    %c0_9 = arith.constant 0 : index
    %12 = vector.load %arg9[%c0_7, %c0_8, %c0_9] : memref<8x8x128xbf16, #tpu.memory_space<vmem>>, vector<8x8x128xbf16>
    tpu.vector_store %arg9[%c0_7, %c0_8, %c0_9], %11 {strides = array<i32>} : memref<8x8x128xbf16, #tpu.memory_space<vmem>>, vector<8x8x128xbf16>,
    %c0_10 = arith.constant 0 : index
    %c0_11 = arith.constant 0 : index
    %13 = vector.load %arg4[%c0_10, %c0_11] : memref<128x128xbf16, #tpu.memory_space<vmem>>, vector<128x128xbf16>
    %c0_12 = arith.constant 0 : index
    %c0_13 = arith.constant 0 : index
    %14 = vector.load %arg10[%c0_12, %c0_13] : memref<8x128xf32, #tpu.memory_space<vmem>>, vector<8x128xf32>
    %c0_i32_14 = arith.constant 0 : i32
    %15 = arith.truncf %14 : vector<8x128xf32> to vector<8x128xbf16>
    %cst_15 = arith.constant dense<0.000000e+00> : vector<8x128xf32>
    %16 = tpu.matmul %15, %13, %cst_15 {dimension_numbers = #tpu.dot_dimension_numbers<[1], [0], [0], [1], [0, 0, 1, 1], [], []>} : vector<8x128xbf16>, vector<128x128xbf16>, vector<8x128xf32> -> vector<8x128xf32>
    %17 = arith.index_cast %c0_i32_14 : i32 to index
    %c0_16 = arith.constant 0 : index
    %c0_17 = arith.constant 0 : index
    %18 = vector.load %arg9[%17, %c0_16, %c0_17] : memref<8x8x128xbf16, #tpu.memory_space<vmem>>, vector<1x8x128xbf16>
    %19 = vector.shape_cast %18 : vector<1x8x128xbf16> to vector<8x128xbf16>
    %20 = arith.extf %19 : vector<8x128xbf16> to vector<8x128xf32>
    %21 = arith.addf %20, %16 : vector<8x128xf32>
    %22 = math.tanh %21 : vector<8x128xf32>
    %c1_i32 = arith.constant 1 : i32
    %23 = arith.truncf %22 : vector<8x128xf32> to vector<8x128xbf16>
    %cst_18 = arith.constant dense<0.000000e+00> : vector<8x128xf32>
    %24 = tpu.matmul %23, %13, %cst_18 {dimension_numbers = #tpu.dot_dimension_numbers<[1], [0], [0], [1], [0, 0, 1, 1], [], []>} : vector<8x128xbf16>, vector<128x128xbf16>, vector<8x128xf32> -> vector<8x128xf32>
    %25 = arith.index_cast %c1_i32 : i32 to index
    %c0_19 = arith.constant 0 : index
    %c0_20 = arith.constant 0 : index
    %26 = vector.load %arg9[%25, %c0_19, %c0_20] : memref<8x8x128xbf16, #tpu.memory_space<vmem>>, vector<1x8x128xbf16>
    %27 = vector.shape_cast %26 : vector<1x8x128xbf16> to vector<8x128xbf16>
    %28 = arith.extf %27 : vector<8x128xbf16> to vector<8x128xf32>
    %29 = arith.addf %28, %24 : vector<8x128xf32>
    %30 = math.tanh %29 : vector<8x128xf32>
    %c2_i32 = arith.constant 2 : i32
    %31 = arith.truncf %30 : vector<8x128xf32> to vector<8x128xbf16>
    %cst_21 = arith.constant dense<0.000000e+00> : vector<8x128xf32>
    %32 = tpu.matmul %31, %13, %cst_21 {dimension_numbers = #tpu.dot_dimension_numbers<[1], [0], [0], [1], [0, 0, 1, 1], [], []>} : vector<8x128xbf16>, vector<128x128xbf16>, vector<8x128xf32> -> vector<8x128xf32>
    %33 = arith.index_cast %c2_i32 : i32 to index
    %c0_22 = arith.constant 0 : index
    %c0_23 = arith.constant 0 : index
    %34 = vector.load %arg9[%33, %c0_22, %c0_23] : memref<8x8x128xbf16, #tpu.memory_space<vmem>>, vector<1x8x128xbf16>
    %35 = vector.shape_cast %34 : vector<1x8x128xbf16> to vector<8x128xbf16>
    %36 = arith.extf %35 : vector<8x128xbf16> to vector<8x128xf32>
    %37 = arith.addf %36, %32 : vector<8x128xf32>
    %38 = math.tanh %37 : vector<8x128xf32>
    %c3_i32 = arith.constant 3 : i32
    %39 = arith.truncf %38 : vector<8x128xf32> to vector<8x128xbf16>
    %cst_24 = arith.constant dense<0.000000e+00> : vector<8x128xf32>
    %40 = tpu.matmul %39, %13, %cst_24 {dimension_numbers = #tpu.dot_dimension_numbers<[1], [0], [0], [1], [0, 0, 1, 1], [], []>} : vector<8x128xbf16>, vector<128x128xbf16>, vector<8x128xf32> -> vector<8x128xf32>
    %41 = arith.index_cast %c3_i32 : i32 to index
    %c0_25 = arith.constant 0 : index
    %c0_26 = arith.constant 0 : index
    %42 = vector.load %arg9[%41, %c0_25, %c0_26] : memref<8x8x128xbf16, #tpu.memory_space<vmem>>, vector<1x8x128xbf16>
    %43 = vector.shape_cast %42 : vector<1x8x128xbf16> to vector<8x128xbf16>
    %44 = arith.extf %43 : vector<8x128xbf16> to vector<8x128xf32>
    %45 = arith.addf %44, %40 : vector<8x128xf32>
    %46 = math.tanh %45 : vector<8x128xf32>
    %c4_i32 = arith.constant 4 : i32
    %47 = arith.truncf %46 : vector<8x128xf32> to vector<8x128xbf16>
    %cst_27 = arith.constant dense<0.000000e+00> : vector<8x128xf32>
    %48 = tpu.matmul %47, %13, %cst_27 {dimension_numbers = #tpu.dot_dimension_numbers<[1], [0], [0], [1], [0, 0, 1, 1], [], []>} : vector<8x128xbf16>, vector<128x128xbf16>, vector<8x128xf32> -> vector<8x128xf32>
    %49 = arith.index_cast %c4_i32 : i32 to index
    %c0_28 = arith.constant 0 : index
    %c0_29 = arith.constant 0 : index
    %50 = vector.load %arg9[%49, %c0_28, %c0_29] : memref<8x8x128xbf16, #tpu.memory_space<vmem>>, vector<1x8x128xbf16>
    %51 = vector.shape_cast %50 : vector<1x8x128xbf16> to vector<8x128xbf16>
    %52 = arith.extf %51 : vector<8x128xbf16> to vector<8x128xf32>
    %53 = arith.addf %52, %48 : vector<8x128xf32>
    %54 = math.tanh %53 : vector<8x128xf32>
    %c5_i32 = arith.constant 5 : i32
    %55 = arith.truncf %54 : vector<8x128xf32> to vector<8x128xbf16>
    %cst_30 = arith.constant dense<0.000000e+00> : vector<8x128xf32>
    %56 = tpu.matmul %55, %13, %cst_30 {dimension_numbers = #tpu.dot_dimension_numbers<[1], [0], [0], [1], [0, 0, 1, 1], [], []>} : vector<8x128xbf16>, vector<128x128xbf16>, vector<8x128xf32> -> vector<8x128xf32>
    %57 = arith.index_cast %c5_i32 : i32 to index
    %c0_31 = arith.constant 0 : index
    %c0_32 = arith.constant 0 : index
    %58 = vector.load %arg9[%57, %c0_31, %c0_32] : memref<8x8x128xbf16, #tpu.memory_space<vmem>>, vector<1x8x128xbf16>
    %59 = vector.shape_cast %58 : vector<1x8x128xbf16> to vector<8x128xbf16>
    %60 = arith.extf %59 : vector<8x128xbf16> to vector<8x128xf32>
    %61 = arith.addf %60, %56 : vector<8x128xf32>
    %62 = math.tanh %61 : vector<8x128xf32>
    %c6_i32 = arith.constant 6 : i32
    %63 = arith.truncf %62 : vector<8x128xf32> to vector<8x128xbf16>
    %cst_33 = arith.constant dense<0.000000e+00> : vector<8x128xf32>
    %64 = tpu.matmul %63, %13, %cst_33 {dimension_numbers = #tpu.dot_dimension_numbers<[1], [0], [0], [1], [0, 0, 1, 1], [], []>} : vector<8x128xbf16>, vector<128x128xbf16>, vector<8x128xf32> -> vector<8x128xf32>
    %65 = arith.index_cast %c6_i32 : i32 to index
    %c0_34 = arith.constant 0 : index
    %c0_35 = arith.constant 0 : index
    %66 = vector.load %arg9[%65, %c0_34, %c0_35] : memref<8x8x128xbf16, #tpu.memory_space<vmem>>, vector<1x8x128xbf16>
    %67 = vector.shape_cast %66 : vector<1x8x128xbf16> to vector<8x128xbf16>
    %68 = arith.extf %67 : vector<8x128xbf16> to vector<8x128xf32>
    %69 = arith.addf %68, %64 : vector<8x128xf32>
    %70 = math.tanh %69 : vector<8x128xf32>
    %c7_i32 = arith.constant 7 : i32
    %71 = arith.truncf %70 : vector<8x128xf32> to vector<8x128xbf16>
    %cst_36 = arith.constant dense<0.000000e+00> : vector<8x128xf32>
    %72 = tpu.matmul %71, %13, %cst_36 {dimension_numbers = #tpu.dot_dimension_numbers<[1], [0], [0], [1], [0, 0, 1, 1], [], []>} : vector<8x128xbf16>, vector<128x128xbf16>, vector<8x128xf32> -> vector<8x128xf32>
    %73 = arith.index_cast %c7_i32 : i32 to index
    %c0_37 = arith.constant 0 : index
    %c0_38 = arith.constant 0 : index
    %74 = vector.load %arg9[%73, %c0_37, %c0_38] : memref<8x8x128xbf16, #tpu.memory_space<vmem>>, vector<1x8x128xbf16>
    %75 = vector.shape_cast %74 : vector<1x8x128xbf16> to vector<8x128xbf16>
    %76 = arith.extf %75 : vector<8x128xbf16> to vector<8x128xf32>
    %77 = arith.addf %76, %72 : vector<8x128xf32>
    %78 = math.tanh %77 : vector<8x128xf32>
    %c8_i32 = arith.constant 8 : i32
    %c0_39 = arith.constant 0 : index
    %c0_40 = arith.constant 0 : index
    %79 = vector.load %arg10[%c0_39, %c0_40] : memref<8x128xf32, #tpu.memory_space<vmem>>, vector<8x128xf32>
    tpu.vector_store %arg10[%c0_39, %c0_40], %78 {strides = array<i32>} : memref<8x128xf32, #tpu.memory_space<vmem>>, vector<8x128xf32>,
    %c0_i32_41 = arith.constant 0 : i32
    %80 = arith.cmpi eq, %arg1, %c0_i32_41 : i32
    %81 = arith.extui %80 : i1 to i32
    %c0_i32_42 = arith.constant 0 : i32
    %82 = arith.cmpi ne, %81, %c0_i32_42 : i32
    scf.if %82 {
      %c0_43 = arith.constant 0 : index
      %c0_44 = arith.constant 0 : index
      %83 = vector.load %arg10[%c0_43, %c0_44] : memref<8x128xf32, #tpu.memory_space<vmem>>, vector<8x128xf32>
      %84 = arith.truncf %83 : vector<8x128xf32> to vector<8x128xbf16>
      %c0_45 = arith.constant 0 : index
      %c0_46 = arith.constant 0 : index
      %85 = vector.load %arg6[%c0_45, %c0_46] : memref<128x128xbf16, #tpu.memory_space<vmem>>, vector<128x128xbf16>
      %cst_47 = arith.constant dense<0.000000e+00> : vector<8x128xf32>
      %86 = tpu.matmul %84, %85, %cst_47 {dimension_numbers = #tpu.dot_dimension_numbers<[1], [0], [0], [1], [0, 0, 1, 1], [], []>} : vector<8x128xbf16>, vector<128x128xbf16>, vector<8x128xf32> -> vector<8x128xf32>
      %c0_48 = arith.constant 0 : index
      %c0_49 = arith.constant 0 : index
      %87 = vector.load %arg7[%c0_48, %c0_49] : memref<1x128xf32, #tpu.memory_space<vmem>>, vector<1x128xf32>
      %88 = vector.broadcast %87 : vector<1x128xf32> to vector<8x128xf32>
      %89 = arith.addf %86, %88 : vector<8x128xf32>
      %c0_50 = arith.constant 0 : index
      %c0_51 = arith.constant 0 : index
      %90 = vector.load %arg8[%c0_50, %c0_51] : memref<8x128xf32, #tpu.memory_space<vmem>>, vector<8x128xf32>
      tpu.vector_store %arg8[%c0_50, %c0_51], %89 {strides = array<i32>} : memref<8x128xf32, #tpu.memory_space<vmem>>, vector<8x128xf32>,
    } else {
    }
    return
  }
  func.func @transform_0(%arg0: i32, %arg1: i32) -> (i32, i32, i32) {
    %c0_i32 = arith.constant 0 : i32
    %c0_i32_0 = arith.constant 0 : i32
    return %arg1, %arg0, %c0_i32 : i32, i32, i32
  }
  func.func @transform_1(%arg0: i32, %arg1: i32) -> (i32, i32) {
    %c0_i32 = arith.constant 0 : i32
    %c0_i32_0 = arith.constant 0 : i32
    %c0_i32_1 = arith.constant 0 : i32
    return %c0_i32, %c0_i32_0 : i32, i32
  }
  func.func @transform_2(%arg0: i32, %arg1: i32) -> (i32, i32) {
    %c0_i32 = arith.constant 0 : i32
    %c0_i32_0 = arith.constant 0 : i32
    %c0_i32_1 = arith.constant 0 : i32
    return %c0_i32, %c0_i32_0 : i32, i32
  }
  func.func @transform_3(%arg0: i32, %arg1: i32) -> (i32, i32) {
    %c0_i32 = arith.constant 0 : i32
    %c0_i32_0 = arith.constant 0 : i32
    %c0_i32_1 = arith.constant 0 : i32
    return %c0_i32, %c0_i32_0 : i32, i32
  }
  func.func @transform_4(%arg0: i32, %arg1: i32) -> (i32, i32) {
    %c0_i32 = arith.constant 0 : i32
    %c0_i32_0 = arith.constant 0 : i32
    %c0_i32_1 = arith.constant 0 : i32
    return %c0_i32, %c0_i32_0 : i32, i32
  }
  func.func @transform_5(%arg0: i32, %arg1: i32) -> (i32, i32) {
    %c0_i32 = arith.constant 0 : i32
    %c0_i32_0 = arith.constant 0 : i32
    %c0_i32_1 = arith.constant 0 : i32
    return %c0_i32, %c0_i32_0 : i32, i32
  }
  func.func @transform_6(%arg0: i32, %arg1: i32) -> (i32, i32) {
    %c0_i32 = arith.constant 0 : i32
    %c0_i32_0 = arith.constant 0 : i32
    return %arg0, %c0_i32 : i32, i32
  }
}

</mosaic_0001>

<bundles_post_ra>
// kernel: rnn_model_forward.1
= control target key start
LH: loop header
LB: loop body
LE: loop exit
PB: predicated region body
PF: predicated region fallthrough
CT: control target
= control target key end

     0   :  { %v1164_v1 = vmov 0.0   ;;  %vm1165_vm0 = vmmov 0   ;;  %v1166_v19 = vmov 0.0|0.0   ;;  %s1465_s1 = inlined_call_operand.vmem [shape: bf16[128,128], index: 1, kind: input, shape index: {}]   ;;  %s1466_s2 = inlined_call_operand.vmem [shape: bf16[128,128], index: 2, kind: input, shape index: {}]   ;;  %s1467_s0 = inlined_call_operand.vmem [shape: bf16[8,8,128], index: 0, kind: input, shape index: {}]   ;;  %s1468_s3 = inlined_call_operand.vmem [shape: f32[1,128], index: 3, kind: input, shape index: {}]   ;;  %s1469_s4 = inlined_call_operand.vmem [shape: bf16[128,128], index: 4, kind: input, shape index: {}]   ;;  %s1470_s5 = inlined_call_operand.vmem [shape: f32[1,128], index: 5, kind: input, shape index: {}]   ;;  %s1471_s6 = inlined_call_operand.vmem [shape: f32[8,128], index: 6, kind: output, shape index: {}]  }
   0x1   :  { %v1120_v0 = vld [vmem:[%s1465_s1 + $0x38] sm:$0xff]   ;;  %937 = vmatprep.subr.bf16.mxu1 %v1164_v1  ;;  %953 = vmatprep.mubr.msk.bf16.mxu1 %vm1165_vm0, %v1164_v1  ;;  %v1121_v2 = vld [vmem:[%s1465_s1 + $0x30] sm:$0xff]   ;;  %v1122_v3 = vld [vmem:[%s1465_s1 + $0x28] sm:$0xff]  }
   0x2   :  { %913 = vmatprep.subr.bf16.mxu0 %v1120_v0  ;;  %v1217_v4 = vld [vmem:[%s1466_s2 + $0x38] sm:$0xff]   ;;  %v1223_v5 = vld [vmem:[%s1466_s2 + $0x30] sm:$0xff]   ;;  %v1123_v6 = vld [vmem:[%s1465_s1 + $0x20] sm:$0xff]  }
   0x3   :  { %914 = vmatpush3.bf16.msra.mxu0 %v1120_v0  ;;  %938 = vmatpush3.bf16.msra.mxu1 %v1217_v4  ;;  %v1233_v7 = vld [vmem:[%s1466_s2 + $0x28] sm:$0xff]   ;;  %v1125_v8 = vld [vmem:[%s1465_s1 + $0x18] sm:$0xff]   ;;  %v1132_v9 = vld [vmem:[%s1467_s0] sm:$0xff]  }
   0x4   :  { %915 = vmatprep.subr.bf16.mxu0 %v1121_v2  ;;  %939 = vmatprep.subr.bf16.mxu1 %v1164_v1  ;;  %v1246_v10 = vld [vmem:[%s1466_s2 + $0x20] sm:$0xff]   ;;  %v1127_v11 = vld [vmem:[%s1465_s1 + $0x10] sm:$0xff]   ;;  %v1255_v12 = vld [vmem:[%s1466_s2 + $0x18] sm:$0xff]  }
   0x5   :  { %929 = vmatprep.mubr.bf16.mxu0 %v1132_v9  ;;  %v1129_v13 = vld [vmem:[%s1465_s1 + $0x8] sm:$0xff]   ;;  %v1266_v14 = vld [vmem:[%s1466_s2 + $0x10] sm:$0xff]   ;;  %v1131_v15 = vld [vmem:[%s1465_s1] sm:$0xff]  }
   0x6   :  { %v1276_v16 = vld [vmem:[%s1466_s2 + $0x8] sm:$0xff]   ;;  %v1286_v18 = vld [vmem:[%s1466_s2] sm:$0xff]   ;;  %v1138_v20 = vld [vmem:[%s1467_s0 + $0x10] sm:$0xff]  }
   0x7   :  { %916 = vmatpush3.bf16.msra.mxu0 %v1121_v2  ;;  %940 = vmatpush3.bf16.msra.mxu1 %v1223_v5  ;;  %v1134_v17 = vld [vmem:[%s1467_s0 + $0x8] sm:$0xff]   ;;  %v1139_v21 = vld [vmem:[%s1467_s0 + $0x18] sm:$0xff]   ;;  %v767_v23 = vld [vmem:[%s1468_s3] ss:$0 sm:$0xff] }
   0x8   :  { %917 = vmatprep.subr.bf16.mxu0 %v1122_v3  ;;  %941 = vmatprep.subr.bf16.mxu1 %v1164_v1 }
   0xb   :  { %918 = vmatpush3.bf16.msra.mxu0 %v1122_v3  ;;  %942 = vmatpush3.bf16.msra.mxu1 %v1233_v7 }
   0xc   :  { %919 = vmatprep.subr.bf16.mxu0 %v1123_v6  ;;  %943 = vmatprep.subr.bf16.mxu1 %v1164_v1 }
   0xf   :  { %920 = vmatpush3.bf16.msra.mxu0 %v1123_v6  ;;  %944 = vmatpush3.bf16.msra.mxu1 %v1246_v10 }
  0x10   :  { %921 = vmatprep.subr.bf16.mxu0 %v1125_v8  ;;  %945 = vmatprep.subr.bf16.mxu1 %v1164_v1 }
  0x13   :  { %922 = vmatpush3.bf16.msra.mxu0 %v1125_v8  ;;  %946 = vmatpush3.bf16.msra.mxu1 %v1255_v12 }
  0x14   :  { %923 = vmatprep.subr.bf16.mxu0 %v1127_v11  ;;  %947 = vmatprep.subr.bf16.mxu1 %v1164_v1 }
  0x17   :  { %924 = vmatpush3.bf16.msra.mxu0 %v1127_v11  ;;  %948 = vmatpush3.bf16.msra.mxu1 %v1266_v14 }
  0x18   :  { %925 = vmatprep.subr.bf16.mxu0 %v1129_v13  ;;  %949 = vmatprep.subr.bf16.mxu1 %v1164_v1 }
  0x1b   :  { %926 = vmatpush3.bf16.msra.mxu0 %v1129_v13  ;;  %950 = vmatpush3.bf16.msra.mxu1 %v1276_v16 }
  0x1c   :  { %927 = vmatprep.subr.bf16.mxu0 %v1131_v15  ;;  %951 = vmatprep.subr.bf16.mxu1 %v1164_v1 }
  0x1f   :  { %928 = vmatpush3.bf16.msra.mxu0 %v1131_v15  ;;  %952 = vmatpush3.bf16.msra.mxu1 %v1286_v18 }
  0x20   :  { %957 = vmatprep.subr.bf16.mxu0 %v1164_v1  ;;  %977 = vmatprep.subr.bf16.mxu1 %v1164_v1 }
  0x22   :  { %930 = vmatmul.mubr.bf16.vlgmr.msra.gmra.mxu0 %v1134_v17  ;;  %954 = vmatmul.mubr.bf16.vlgmr.msra.gmra.mxu1 %v1166_v19 }
  0x23   :  { %958 = vmatpush3.bf16.msra.mxu0 %v1217_v4  ;;  %978 = vmatpush3.bf16.msra.mxu1 %v1217_v4 }
  0x24   :  { %959 = vmatprep.subr.bf16.mxu0 %v1164_v1  ;;  %993 = vmatprep.mubr.msk.bf16.mxu1 %vm1165_vm0, %v1164_v1 }
  0x25   :  { %979 = vmatprep.subr.bf16.mxu1 %v1164_v1  ;;  %933 = vmatprep.mubr.bf16.mxu0 %v1138_v20 }
  0x27   :  { %960 = vmatpush3.bf16.msra.mxu0 %v1223_v5  ;;  %980 = vmatpush3.bf16.msra.mxu1 %v1223_v5 }
  0x28   :  { %961 = vmatprep.subr.bf16.mxu0 %v1164_v1  ;;  %981 = vmatprep.subr.bf16.mxu1 %v1164_v1 }
  0x2a   :  { %934 = vmatmul.mubr.bf16.gmra.mxu0 %v1139_v21 }
  0x2b   :  { %962 = vmatpush3.bf16.msra.mxu0 %v1233_v7  ;;  %982 = vmatpush3.bf16.msra.mxu1 %v1233_v7 }
  0x2c   :  { %963 = vmatprep.subr.bf16.mxu0 %v1164_v1  ;;  %983 = vmatprep.subr.bf16.mxu1 %v1164_v1 }
  0x2d   :  { %973 = vmatprep.mubr.msk.bf16.mxu0 %vm1165_vm0, %v1164_v1 }
  0x2f   :  { %964 = vmatpush3.bf16.msra.mxu0 %v1246_v10  ;;  %984 = vmatpush3.bf16.msra.mxu1 %v1246_v10 }
  0x30   :  { %965 = vmatprep.subr.bf16.mxu0 %v1164_v1  ;;  %985 = vmatprep.subr.bf16.mxu1 %v1164_v1 }
  0x33   :  { %966 = vmatpush3.bf16.msra.mxu0 %v1255_v12  ;;  %986 = vmatpush3.bf16.msra.mxu1 %v1255_v12 }
  0x34   :  { %967 = vmatprep.subr.bf16.mxu0 %v1164_v1  ;;  %987 = vmatprep.subr.bf16.mxu1 %v1164_v1 }
  0x37   :  { %968 = vmatpush3.bf16.msra.mxu0 %v1266_v14  ;;  %988 = vmatpush3.bf16.msra.mxu1 %v1266_v14 }
  0x38   :  { %969 = vmatprep.subr.bf16.mxu0 %v1164_v1  ;;  %989 = vmatprep.subr.bf16.mxu1 %v1164_v1 }
  0x3b   :  { %970 = vmatpush3.bf16.msra.mxu0 %v1276_v16  ;;  %990 = vmatpush3.bf16.msra.mxu1 %v1276_v16 }
  0x3c   :  { %971 = vmatprep.subr.bf16.mxu0 %v1164_v1  ;;  %991 = vmatprep.subr.bf16.mxu1 %v1164_v1 }
  0x3f   :  { %972 = vmatpush3.bf16.msra.mxu0 %v1286_v18  ;;  %992 = vmatpush3.bf16.msra.mxu1 %v1286_v18 }
  0x40   :  { %997 = vmatprep.subr.bf16.mxu0 %v1164_v1  ;;  %1017 = vmatprep.subr.bf16.mxu1 %v1164_v1 }
  0xe2   :  { %v931_v22 = vpop.f32.mrf.mxu0  ;;  %v313_v25 = vpop.f32.mrf.mxu1 }
  0xe3   :  { %v175_v27 = vadd.f32 %v931_v22, %v767_v23 }
  0xe4   :  { %v166_v24 = vpop.f32.mrf.mxu0  ;;  %v955_v29 = vpop.f32.mrf.mxu1 }
  0xe5   :  { %v167_v31 = vadd.f32 %v767_v23, %v166_v24 }
  0xe6   :  { %v932_v26 = vpop.f32.mrf.mxu0  ;;  %v316_v34 = vpop.f32.mrf.mxu1 }
  0xe7   :  { %v178_v28 = vadd.f32 %v932_v26, %v767_v23 }
  0xe8   :  { %v169_v30 = vpop.f32.mrf.mxu0  ;;  %v956_v36 = vpop.f32.mrf.mxu1 }
  0xe9   :  { %v805_v32 = vpack.c.bf16 %v178_v28, %v175_v27  ;;  %v170_v33 = vadd.f32 %v767_v23, %v169_v30 }
  0xea   :  { %v935_v42 = vpop.f32.mrf.mxu0 }
  0xeb   :  { %817 = vst [vmem:[#allocation2 + $0x8] sm:$0xff] %v805_v32   ;;  %v800_v35 = vpack.c.bf16 %v170_v33, %v167_v31  ;;  %v191_v44 = vadd.f32 %v935_v42, %v767_v23 }
  0xec   :  { %v182_v43 = vpop.f32.mrf.mxu0 }
  0xed   :  { %801 = vst [vmem:[#allocation2] sm:$0xff] %v800_v35   ;;  %v183_v46 = vadd.f32 %v767_v23, %v182_v43  ;;  %v1143_v43 = vld [vmem:[%s1469_s4 + $0x20] sm:$0xff]  }
  0xee   :  { %v936_v45 = vpop.f32.mrf.mxu0 }
  0xef   :  { %v194_v47 = vadd.f32 %v936_v45, %v767_v23  ;;  %v1145_v45 = vld [vmem:[%s1469_s4 + $0x10] sm:$0xff]  }
  0xf0   :  { %v185_v48 = vpop.f32.mrf.mxu0 }
  0xf1   :  { %v815_v49 = vpack.c.bf16 %v194_v47, %v191_v44  ;;  %v186_v50 = vadd.f32 %v767_v23, %v185_v48  ;;  %v1144_v44 = vld [vmem:[%s1469_s4 + $0x18] sm:$0xff]   ;;  %v1147_v47 = vld [vmem:[%s1469_s4] sm:$0xff]  }
  0xf2   :  { %v411_v60 = vld [vmem:[#allocation2 + $0x8] sm:$0xff]  }
  0xf3   :  { %819 = vst [vmem:[#allocation2 + $0x18] sm:$0xff] %v815_v49   ;;  %v810_v51 = vpack.c.bf16 %v186_v50, %v183_v46  ;;  %v412_v61 = vunpack.c.l.bf16 %v411_v60  ;;  %v458_v9 = vunpack.c.h.bf16 %v411_v60  ;;  %v1146_v46 = vld [vmem:[%s1469_s4 + $0x8] sm:$0xff]  }
  0xf4   :  { %v319_v37 = vld [vmem:[#allocation2] sm:$0xff]  }
  0xf5   :  { %v320_v38 = vunpack.c.l.bf16 %v319_v37  ;;  %818 = vst [vmem:[#allocation2 + $0x10] sm:$0xff] %v810_v51   ;;  %v366_v52 = vunpack.c.h.bf16 %v319_v37 }
  0xf7   :  { %v321_v39 = vadd.f32 %v320_v38, %v313_v25 }
  0xf9   :  { %1148 = vtanh.f32 %v321_v39 }
  0xfa   :  { %v595_v34 = vld [vmem:[#allocation2 + $0x18] sm:$0xf]  ;;  %v641_v48 = vld [vmem:[#allocation2 + $0x1c] sm:$0xf] }
  0xfb   :  { %v596_v35 = vunpack.c.l.bf16 %v595_v34  ;;  %v642_v49 = vunpack.c.l.bf16 %v641_v48 }
  0xfc   :  { %v503_v22 = vld [vmem:[#allocation2 + $0x10] sm:$0xff]  }
  0xfd   :  { %v504_v23 = vunpack.c.l.bf16 %v503_v22 }
 0x106   :  { %v1149_v40 = vpop.eup %1148 }
 0x107   :  { %v323_v41 = vpack.c.bf16 %v1149_v40, %v1149_v40 }
 0x109   :  { %974 = vmatmul.mubr.bf16.vlgmr.msra.gmra.mxu0 %v323_v41 }
 0x10a   :  { %998 = vmatpush3.bf16.msra.mxu0 %v1217_v4  ;;  %1013 = vmatprep.mubr.msk.bf16.mxu0 %vm1165_vm0, %v1164_v1 }
 0x10b   :  { %999 = vmatprep.subr.bf16.mxu0 %v1164_v1 }
 0x10e   :  { %1000 = vmatpush3.bf16.msra.mxu0 %v1223_v5 }
 0x10f   :  { %1001 = vmatprep.subr.bf16.mxu0 %v1164_v1 }
 0x112   :  { %1002 = vmatpush3.bf16.msra.mxu0 %v1233_v7 }
 0x113   :  { %1003 = vmatprep.subr.bf16.mxu0 %v1164_v1 }
 0x116   :  { %1004 = vmatpush3.bf16.msra.mxu0 %v1246_v10 }
 0x117   :  { %1005 = vmatprep.subr.bf16.mxu0 %v1164_v1 }
 0x11a   :  { %1006 = vmatpush3.bf16.msra.mxu0 %v1255_v12 }
 0x11b   :  { %1007 = vmatprep.subr.bf16.mxu0 %v1164_v1 }
 0x11e   :  { %1008 = vmatpush3.bf16.msra.mxu0 %v1266_v14 }
 0x11f   :  { %1009 = vmatprep.subr.bf16.mxu0 %v1164_v1 }
 0x122   :  { %1010 = vmatpush3.bf16.msra.mxu0 %v1276_v16 }
 0x123   :  { %1011 = vmatprep.subr.bf16.mxu0 %v1164_v1 }
 0x126   :  { %1012 = vmatpush3.bf16.msra.mxu0 %v1286_v18 }
 0x127   :  { %1037 = vmatprep.subr.bf16.mxu0 %v1164_v1 }
 0x1c9   :  { %v358_v53 = vpop.f32.mrf.mxu0 }
 0x1ca   :  { %v367_v54 = vadd.f32 %v366_v52, %v358_v53 }
 0x1cb   :  { %v975_v55 = vpop.f32.mrf.mxu0 }
 0x1cc   :  { %1150 = vtanh.f32 %v367_v54 }
 0x1cd   :  { %v361_v56 = vpop.f32.mrf.mxu0 }
 0x1cf   :  { %v976_v57 = vpop.f32.mrf.mxu0 }
 0x1d9   :  { %v1151_v58 = vpop.eup %1150 }
 0x1da   :  { %v369_v59 = vpack.c.bf16 %v1151_v58, %v1151_v58 }
 0x1dc   :  { %994 = vmatmul.mubr.bf16.vlgmr.msra.gmra.mxu1 %v369_v59 }
 0x1dd   :  { %1018 = vmatpush3.bf16.msra.mxu1 %v1217_v4  ;;  %1033 = vmatprep.mubr.msk.bf16.mxu1 %vm1165_vm0, %v1164_v1 }
 0x1de   :  { %1019 = vmatprep.subr.bf16.mxu1 %v1164_v1 }
 0x1e1   :  { %1020 = vmatpush3.bf16.msra.mxu1 %v1223_v5 }
 0x1e2   :  { %1021 = vmatprep.subr.bf16.mxu1 %v1164_v1 }
 0x1e5   :  { %1022 = vmatpush3.bf16.msra.mxu1 %v1233_v7 }
 0x1e6   :  { %1023 = vmatprep.subr.bf16.mxu1 %v1164_v1 }
 0x1e9   :  { %1024 = vmatpush3.bf16.msra.mxu1 %v1246_v10 }
 0x1ea   :  { %1025 = vmatprep.subr.bf16.mxu1 %v1164_v1 }
 0x1ed   :  { %1026 = vmatpush3.bf16.msra.mxu1 %v1255_v12 }
 0x1ee   :  { %1027 = vmatprep.subr.bf16.mxu1 %v1164_v1 }
 0x1f1   :  { %1028 = vmatpush3.bf16.msra.mxu1 %v1266_v14 }
 0x1f2   :  { %1029 = vmatprep.subr.bf16.mxu1 %v1164_v1 }
 0x1f5   :  { %1030 = vmatpush3.bf16.msra.mxu1 %v1276_v16 }
 0x1f6   :  { %1031 = vmatprep.subr.bf16.mxu1 %v1164_v1 }
 0x1f9   :  { %1032 = vmatpush3.bf16.msra.mxu1 %v1286_v18 }
 0x1fa   :  { %1057 = vmatprep.subr.bf16.mxu1 %v1164_v1 }
 0x29c   :  { %v404_v62 = vpop.f32.mrf.mxu1 }
 0x29d   :  { %v413_v63 = vadd.f32 %v412_v61, %v404_v62 }
 0x29e   :  { %v995_v0 = vpop.f32.mrf.mxu1 }
 0x29f   :  { %1152 = vtanh.f32 %v413_v63 }
 0x2a0   :  { %v407_v2 = vpop.f32.mrf.mxu1 }
 0x2a2   :  { %v996_v3 = vpop.f32.mrf.mxu1 }
 0x2ac   :  { %v1153_v6 = vpop.eup %1152 }
 0x2ad   :  { %v415_v8 = vpack.c.bf16 %v1153_v6, %v1153_v6 }
 0x2af   :  { %1014 = vmatmul.mubr.bf16.vlgmr.msra.gmra.mxu0 %v415_v8 }
 0x2b0   :  { %1038 = vmatpush3.bf16.msra.mxu0 %v1217_v4  ;;  %1053 = vmatprep.mubr.msk.bf16.mxu0 %vm1165_vm0, %v1164_v1 }
 0x2b1   :  { %1039 = vmatprep.subr.bf16.mxu0 %v1164_v1 }
 0x2b4   :  { %1040 = vmatpush3.bf16.msra.mxu0 %v1223_v5 }
 0x2b5   :  { %1041 = vmatprep.subr.bf16.mxu0 %v1164_v1 }
 0x2b8   :  { %1042 = vmatpush3.bf16.msra.mxu0 %v1233_v7 }
 0x2b9   :  { %1043 = vmatprep.subr.bf16.mxu0 %v1164_v1 }
 0x2bc   :  { %1044 = vmatpush3.bf16.msra.mxu0 %v1246_v10 }
 0x2bd   :  { %1045 = vmatprep.subr.bf16.mxu0 %v1164_v1 }
 0x2c0   :  { %1046 = vmatpush3.bf16.msra.mxu0 %v1255_v12 }
 0x2c1   :  { %1047 = vmatprep.subr.bf16.mxu0 %v1164_v1 }
 0x2c4   :  { %1048 = vmatpush3.bf16.msra.mxu0 %v1266_v14 }
 0x2c5   :  { %1049 = vmatprep.subr.bf16.mxu0 %v1164_v1 }
 0x2c8   :  { %1050 = vmatpush3.bf16.msra.mxu0 %v1276_v16 }
 0x2c9   :  { %1051 = vmatprep.subr.bf16.mxu0 %v1164_v1 }
 0x2cc   :  { %1052 = vmatpush3.bf16.msra.mxu0 %v1286_v18 }
 0x2cd   :  { %1077 = vmatprep.subr.bf16.mxu0 %v1164_v1 }
 0x36f   :  { %v450_v11 = vpop.f32.mrf.mxu0 }
 0x370   :  { %v459_v13 = vadd.f32 %v458_v9, %v450_v11 }
 0x371   :  { %v1015_v15 = vpop.f32.mrf.mxu0 }
 0x372   :  { %1154 = vtanh.f32 %v459_v13 }
 0x373   :  { %v453_v17 = vpop.f32.mrf.mxu0 }
 0x375   :  { %v1016_v19 = vpop.f32.mrf.mxu0 }
 0x37f   :  { %v1155_v20 = vpop.eup %1154 }
 0x380   :  { %v461_v21 = vpack.c.bf16 %v1155_v20, %v1155_v20 }
 0x382   :  { %1034 = vmatmul.mubr.bf16.vlgmr.msra.gmra.mxu1 %v461_v21 }
 0x383   :  { %1058 = vmatpush3.bf16.msra.mxu1 %v1217_v4  ;;  %1073 = vmatprep.mubr.msk.bf16.mxu1 %vm1165_vm0, %v1164_v1 }
 0x384   :  { %1059 = vmatprep.subr.bf16.mxu1 %v1164_v1 }
 0x387   :  { %1060 = vmatpush3.bf16.msra.mxu1 %v1223_v5 }
 0x388   :  { %1061 = vmatprep.subr.bf16.mxu1 %v1164_v1 }
 0x38b   :  { %1062 = vmatpush3.bf16.msra.mxu1 %v1233_v7 }
 0x38c   :  { %1063 = vmatprep.subr.bf16.mxu1 %v1164_v1 }
 0x38f   :  { %1064 = vmatpush3.bf16.msra.mxu1 %v1246_v10 }
 0x390   :  { %1065 = vmatprep.subr.bf16.mxu1 %v1164_v1 }
 0x393   :  { %1066 = vmatpush3.bf16.msra.mxu1 %v1255_v12 }
 0x394   :  { %1067 = vmatprep.subr.bf16.mxu1 %v1164_v1 }
 0x397   :  { %1068 = vmatpush3.bf16.msra.mxu1 %v1266_v14 }
 0x398   :  { %1069 = vmatprep.subr.bf16.mxu1 %v1164_v1 }
 0x39b   :  { %1070 = vmatpush3.bf16.msra.mxu1 %v1276_v16 }
 0x39c   :  { %1071 = vmatprep.subr.bf16.mxu1 %v1164_v1 }
 0x39f   :  { %1072 = vmatpush3.bf16.msra.mxu1 %v1286_v18 }
 0x3a0   :  { %1097 = vmatprep.subr.bf16.mxu1 %v1164_v1 }
 0x442   :  { %v496_v24 = vpop.f32.mrf.mxu1 }
 0x443   :  { %v505_v25 = vadd.f32 %v504_v23, %v496_v24 }
 0x444   :  { %v1035_v26 = vpop.f32.mrf.mxu1 }
 0x445   :  { %1156 = vtanh.f32 %v505_v25 }
 0x446   :  { %v499_v27 = vpop.f32.mrf.mxu1 }
 0x448   :  { %v1036_v28 = vpop.f32.mrf.mxu1 }
 0x452   :  { %v1157_v29 = vpop.eup %1156 }
 0x453   :  { %v507_v30 = vpack.c.bf16 %v1157_v29, %v1157_v29 }
 0x455   :  { %1054 = vmatmul.mubr.bf16.vlgmr.msra.gmra.mxu0 %v507_v30 }
 0x456   :  { %1078 = vmatpush3.bf16.msra.mxu0 %v1217_v4  ;;  %1093 = vmatprep.mubr.msk.bf16.mxu0 %vm1165_vm0, %v1164_v1  ;;  %v550_v4 = vunpack.c.h.bf16 %v503_v22 }
 0x457   :  { %1079 = vmatprep.subr.bf16.mxu0 %v1164_v1 }
 0x45a   :  { %1080 = vmatpush3.bf16.msra.mxu0 %v1223_v5 }
 0x45b   :  { %1081 = vmatprep.subr.bf16.mxu0 %v1164_v1 }
 0x45e   :  { %1082 = vmatpush3.bf16.msra.mxu0 %v1233_v7 }
 0x45f   :  { %1083 = vmatprep.subr.bf16.mxu0 %v1164_v1 }
 0x462   :  { %1084 = vmatpush3.bf16.msra.mxu0 %v1246_v10 }
 0x463   :  { %1085 = vmatprep.subr.bf16.mxu0 %v1164_v1 }
 0x466   :  { %1086 = vmatpush3.bf16.msra.mxu0 %v1255_v12 }
 0x467   :  { %1087 = vmatprep.subr.bf16.mxu0 %v1164_v1 }
 0x46a   :  { %1088 = vmatpush3.bf16.msra.mxu0 %v1266_v14  ;;  %v1140_v14 = vld [vmem:[%s1469_s4 + $0x38] sm:$0xff]  }
 0x46b   :  { %1089 = vmatprep.subr.bf16.mxu0 %v1164_v1 }
 0x46e   :  { %1090 = vmatpush3.bf16.msra.mxu0 %v1276_v16  ;;  %v1141_v16 = vld [vmem:[%s1469_s4 + $0x30] sm:$0xff]  }
 0x46f   :  { %1091 = vmatprep.subr.bf16.mxu0 %v1164_v1 }
 0x472   :  { %1092 = vmatpush3.bf16.msra.mxu0 %v1286_v18  ;;  %v1142_v18 = vld [vmem:[%s1469_s4 + $0x28] sm:$0xff]  }
 0x515   :  { %v542_v5 = vpop.f32.mrf.mxu0 }
 0x516   :  { %v551_v7 = vadd.f32 %v550_v4, %v542_v5 }
 0x517   :  { %v1055_v10 = vpop.f32.mrf.mxu0 }
 0x518   :  { %1158 = vtanh.f32 %v551_v7 }
 0x519   :  { %v545_v31 = vpop.f32.mrf.mxu0 }
 0x51b   :  { %v1056_v32 = vpop.f32.mrf.mxu0 }
 0x525   :  { %v1159_v12 = vpop.eup %1158 }
 0x526   :  { %v553_v33 = vpack.c.bf16 %v1159_v12, %v1159_v12 }
 0x528   :  { %1074 = vmatmul.mubr.bf16.vlgmr.msra.gmra.mxu1 %v553_v33 }
 0x529   :  { %1113 = vmatprep.mubr.msk.bf16.mxu1 %vm1165_vm0, %v1164_v1  ;;  %1098 = vmatpush3.bf16.msra.mxu1 %v1140_v14 }
 0x52a   :  { %1099 = vmatprep.subr.bf16.mxu1 %v1164_v1 }
 0x52d   :  { %1100 = vmatpush3.bf16.msra.mxu1 %v1141_v16 }
 0x52e   :  { %1101 = vmatprep.subr.bf16.mxu1 %v1164_v1 }
 0x531   :  { %1102 = vmatpush3.bf16.msra.mxu1 %v1142_v18 }
 0x532   :  { %1103 = vmatprep.subr.bf16.mxu1 %v1164_v1 }
 0x535   :  { %1104 = vmatpush3.bf16.msra.mxu1 %v1143_v43 }
 0x536   :  { %1105 = vmatprep.subr.bf16.mxu1 %v1164_v1 }
 0x539   :  { %1106 = vmatpush3.bf16.msra.mxu1 %v1144_v44 }
 0x53a   :  { %1107 = vmatprep.subr.bf16.mxu1 %v1164_v1 }
 0x53d   :  { %1108 = vmatpush3.bf16.msra.mxu1 %v1145_v45 }
 0x53e   :  { %1109 = vmatprep.subr.bf16.mxu1 %v1164_v1 }
 0x541   :  { %1110 = vmatpush3.bf16.msra.mxu1 %v1146_v46 }
 0x542   :  { %1111 = vmatprep.subr.bf16.mxu1 %v1164_v1  ;;  %v788_v1 = vld [vmem:[%s1470_s5] ss:$0 sm:$0xff] }
 0x545   :  { %1112 = vmatpush3.bf16.msra.mxu1 %v1147_v47 }
 0x5e8   :  { %v588_v36 = vpop.f32.mrf.mxu1 }
 0x5e9   :  { %v597_v37 = vadd.f32 %v596_v35, %v588_v36 }
 0x5ea   :  { %v1075_v38 = vpop.f32.mrf.mxu1 }
 0x5eb   :  { %1160 = vtanh.f32 %v597_v37 }
 0x5ec   :  { %v591_v39 = vpop.f32.mrf.mxu1 }
 0x5ee   :  { %v1076_v40 = vpop.f32.mrf.mxu1 }
 0x5f8   :  { %v1161_v41 = vpop.eup %1160 }
 0x5f9   :  { %v599_v42 = vpack.c.bf16 %v1161_v41, %v1161_v41 }
 0x5fb   :  { %1094 = vmatmul.mubr.bf16.vlgmr.msra.gmra.mxu0 %v599_v42 }
 0x6bb   :  { %v634_v50 = vpop.f32.mrf.mxu0 }
 0x6bc   :  { %v643_v51 = vadd.f32 %v642_v49, %v634_v50 }
 0x6bd   :  { %v1095_v52 = vpop.f32.mrf.mxu0 }
 0x6be   :  { %1162 = vtanh.f32 %v643_v51 }
 0x6bf   :  { %v637_v53 = vpop.f32.mrf.mxu0 }
 0x6c1   :  { %v1096_v54 = vpop.f32.mrf.mxu0 }
 0x6cb   :  { %v1163_v55 = vpop.eup %1162 }
 0x6cc   :  { %v650_v56 = vpack.c.bf16 %v1163_v55, %v1163_v55 }
 0x6ce   :  { %1114 = vmatmul.mubr.bf16.vlgmr.msra.gmra.mxu1 %v650_v56 }
 0x78e   :  { %v756_v57 = vpop.f32.mrf.mxu1 }
 0x78f   :  { %v757_v58 = vadd.f32 %v788_v1, %v756_v57 }
 0x790   :  { %v1115_v59 = vpop.f32.mrf.mxu1 }
 0x791   :  { %762 = vst [vmem:[%s1471_s6] sm:$0xff] %v757_v58 }
 0x792   :  { %v759_v60 = vpop.f32.mrf.mxu1 }
 0x794   :  { %v1116_v61 = vpop.f32.mrf.mxu1 }

</bundles_post_ra>
